<compile_context>
chip_gen: v5e
topology: v5e:2x2
jax: 0.10.0
libtpu: 0.0.40
codegen_flags: <defaults>
</compile_context>

<pallas_src>
import jax
import jax.numpy as jnp
from jax.experimental import pallas as pl
from jax.experimental.pallas import tpu as pltpu


_LANE_WIDTH = 1024      # lane-dense last dim (multiple of 128)
_MAX_ROW_BLOCK = 512    # (512, 1024) f32 block = 2 MiB


def _round_up(n: int, m: int) -> int:
    return ((n + m - 1) // m) * m


def _make_envelope_kernel(p: int, a: float, b: float, c: float):
    """Returns a Pallas kernel body with the envelope coefficients baked in."""

    def kernel(x_ref, o_ref):
        x = x_ref[...]
        inv_x = 1.0 / x                  # exact divide (keeps 1e-5 tolerance)
        x_pow_pm1 = x ** (p - 1)         # static integer power -> repeated muls
        # Horner form on the shared x^(p-1) factor.
        poly = a + x * (b + c * x)
        o_ref[...] = inv_x + x_pow_pm1 * poly

    return kernel


def envelope_pallas(x: jax.Array, exponent: int) -> jax.Array:
    """Envelope forward for an arbitrary-shape array via a lane-dense Pallas kernel."""
    p = exponent + 1
    a = float(-(p + 1) * (p + 2) / 2)
    b = float(p * (p + 2))
    c = float(-p * (p + 1) / 2)

    orig_shape = x.shape
    orig_dtype = x.dtype

    # Flatten and repack into a lane-dense (rows, _LANE_WIDTH) slab.
    flat = x.reshape(-1)
    n_elems = flat.shape[0]
    tn = _LANE_WIDTH
    rows = -(-n_elems // tn)                      # cdiv
    tm = min(_MAX_ROW_BLOCK, _round_up(max(rows, 1), 8))
    padded_rows = _round_up(max(rows, 1), tm)
    padded_elems = padded_rows * tn

    if padded_elems != n_elems:
        # Pad with 1.0 so 1/x on padded elements stays finite (values discarded).
        flat = jnp.pad(flat, (0, padded_elems - n_elems), constant_values=1.0)
    x2d = flat.reshape(padded_rows, tn)

    kernel = _make_envelope_kernel(p, a, b, c)

    out2d = pl.pallas_call(
        kernel,
        out_shape=jax.ShapeDtypeStruct((padded_rows, tn), orig_dtype),
        grid_spec=pltpu.PrefetchScalarGridSpec(
            num_scalar_prefetch=0,
            grid=(padded_rows // tm,),
            in_specs=[pl.BlockSpec((tm, tn), lambda i: (i, 0))],
            out_specs=pl.BlockSpec((tm, tn), lambda i: (i, 0)),
        ),
        compiler_params=pltpu.CompilerParams(
            dimension_semantics=("parallel",),
        ),
    )(x2d)

    return out2d.reshape(-1)[:n_elems].reshape(orig_shape)


def envelope(x: jax.Array, exponent: int, *, min_pallas_elements: int = 1 << 16) -> jax.Array:
    """Size-dispatching wrapper: tiny inputs are cheaper as a fused XLA expression."""
    if x.size < min_pallas_elements:
        return envelope_ref(x, exponent)
    return envelope_pallas(x, exponent)


def envelope_ref(x: jax.Array, exponent: int) -> jax.Array:
    """Pure-JAX reference matching the PyTorch module exactly."""
    p = exponent + 1
    a = -(p + 1) * (p + 2) / 2
    b = p * (p + 2)
    c = -p * (p + 1) / 2
    x_pow_p0 = x ** (p - 1)
    x_pow_p1 = x_pow_p0 * x
    x_pow_p2 = x_pow_p1 * x
    return 1.0 / x + a * x_pow_p0 + b * x_pow_p1 + c * x_pow_p2


if __name__ == "__main__":
    key = jax.random.PRNGKey(0)
    exponent = 5  # typical DimeNet value; Envelope has no learned parameters

    # Small shape: distances for 16*256 edges laid out as [16, 256], values in
    # (0, 1] like normalized distances d / cutoff (avoid 0 for 1/x).
    k1, k2 = jax.random.split(key)
    x_small = jax.random.uniform(k1, (16, 256), dtype=jnp.float32,
                                 minval=0.05, maxval=1.0)

    out_small = jax.block_until_ready(envelope_pallas(x_small, exponent))
    ref_small = envelope_ref(x_small, exponent)
    assert out_small.shape == ref_small.shape and out_small.dtype == ref_small.dtype
    assert jnp.allclose(out_small, ref_small, rtol=1e-5, atol=1e-5), "small mismatch"

    # Moderate shape exercising the multi-step, large-block (512, 1024) path.
    x_big = jax.random.uniform(k2, (1024, 1024), dtype=jnp.float32,
                               minval=0.05, maxval=1.0)
    out_big = jax.block_until_ready(envelope_pallas(x_big, exponent))
    ref_big = envelope_ref(x_big, exponent)
    assert jnp.allclose(out_big, ref_big, rtol=1e-5, atol=1e-5), "big mismatch"

    print("KERNEL_OK")
</pallas_src>

<mosaic_0001>
module attributes {stable_mosaic.version = 11 : i64} {
  func.func @kernel(%arg0: i32, %arg1: memref<8x1024xf32, #tpu.memory_space<vmem>>, %arg2: memref<8x1024xf32, #tpu.memory_space<vmem>>) attributes {dimension_semantics = [#tpu.dimension_semantics<parallel>], iteration_bounds = array<i64: 1>, scalar_prefetch = 0 : i64, scratch_operands = 0 : i64, tpu.core_type = #tpu.core_type<tc>, window_params = [{transform_indices = @transform_0, window_bounds = array<i64: 8, 1024>}, {transform_indices = @transform_1, window_bounds = array<i64: 8, 1024>}]} {
    %c0 = arith.constant 0 : index
    %c0_0 = arith.constant 0 : index
    %0 = vector.load %arg1[%c0, %c0_0] : memref<8x1024xf32, #tpu.memory_space<vmem>>, vector<8x1024xf32>
    %cst = arith.constant 1.000000e+00 : f32
    %1 = vector.broadcast %cst : f32 to vector<8x1024xf32>
    %2 = arith.divf %1, %0 : vector<8x1024xf32>
    %3 = arith.mulf %0, %0 : vector<8x1024xf32>
    %4 = arith.mulf %3, %3 : vector<8x1024xf32>
    %5 = arith.mulf %0, %4 : vector<8x1024xf32>
    %cst_1 = arith.constant -2.100000e+01 : f32
    %6 = vector.broadcast %cst_1 : f32 to vector<8x1024xf32>
    %7 = arith.mulf %6, %0 : vector<8x1024xf32>
    %cst_2 = arith.constant 4.800000e+01 : f32
    %8 = vector.broadcast %cst_2 : f32 to vector<8x1024xf32>
    %9 = arith.addf %8, %7 : vector<8x1024xf32>
    %10 = arith.mulf %0, %9 : vector<8x1024xf32>
    %cst_3 = arith.constant -2.800000e+01 : f32
    %11 = vector.broadcast %cst_3 : f32 to vector<8x1024xf32>
    %12 = arith.addf %11, %10 : vector<8x1024xf32>
    %13 = arith.mulf %5, %12 : vector<8x1024xf32>
    %14 = arith.addf %2, %13 : vector<8x1024xf32>
    %c0_4 = arith.constant 0 : index
    %c0_5 = arith.constant 0 : index
    %15 = vector.load %arg2[%c0_4, %c0_5] : memref<8x1024xf32, #tpu.memory_space<vmem>>, vector<8x1024xf32>
    tpu.vector_store %arg2[%c0_4, %c0_5], %14 {strides = array<i32>} : memref<8x1024xf32, #tpu.memory_space<vmem>>, vector<8x1024xf32>,
    return
  }
  func.func @transform_0(%arg0: i32) -> (i32, i32) {
    %c0_i32 = arith.constant 0 : i32
    %c0_i32_0 = arith.constant 0 : i32
    return %arg0, %c0_i32 : i32, i32
  }
  func.func @transform_1(%arg0: i32) -> (i32, i32) {
    %c0_i32 = arith.constant 0 : i32
    %c0_i32_0 = arith.constant 0 : i32
    return %arg0, %c0_i32 : i32, i32
  }
}

</mosaic_0001>

<bundles_post_ra>
// kernel: tpu_custom_call.1
= control target key start
LH: loop header
LB: loop body
LE: loop exit
PB: predicated region body
PF: predicated region fallthrough
CT: control target
= control target key end

     0   :  { %6 = vsyncpa [#allocation3], 0  ;;  %s497_s0 = inlined_call_operand.hbm [shape: f32[8,1024], index: 0, kind: input, shape index: {}]   ;;  %s498_s1 = inlined_call_operand.hbm [shape: f32[8,1024], index: 1, kind: output, shape index: {}]  }
   0x1   :  { %7 = vsyncpa [#allocation4], 0  ;;  %s13_s8 = sshll.u32 %s497_s0, 4  ;;  %s318_s9 = smov [#allocation2]   ;;  %s14_s8 = int_to_ptr.hbm [resolvable:$true] %s13_s8 }
   0x2   :  { %s15_s10 = sshll.u32 %s318_s9, 4  ;;  %s16_s10 = int_to_ptr.vmem [resolvable:$true] %s15_s10 }
   0x3   :  { %18 = dma.hbm_to_vmem [thread:$0]  %s14_s8, 1024, %s16_s10, [#allocation3]  }
   0x4   :  { %314 = dma.done.wait [#allocation3], 1024  }
   0x5   :  { %315 = vsyncadd [#allocation3], 4294966272  ;;  %v23_v0 = vld [vmem:[#allocation2] sm:$0xff]  ;;  %v24_v1 = vld [vmem:[#allocation2 + $0x8] sm:$0xff]  ;;  %s319_s0 = smov [#allocation5]   ;;  %s238_s14 = sshll.u32 %s498_s1, 4  ;;  %s239_s14 = int_to_ptr.hbm [resolvable:$true] %s238_s14 }
   0x6   :  { %250 = vrcp.f32 %v23_v0  ;;  %v40_v2 = vand.u32 2147483647, %v23_v0  ;;  %v42_v3 = vand.u32 2147483648, %v23_v0  ;;  %v151_v4 = vmul.f32 %v23_v0, %v23_v0  ;;  %v333_v6 = vld [vmem:[#allocation2 + $0x10] sm:$0xff]  ;;  %v349_v27 = vld [vmem:[#allocation2 + $0x18] sm:$0xff]  ;;  %s236_s11 = sshll.u32 %s319_s0, 4  ;;  %s237_s11 = int_to_ptr.vmem [resolvable:$true] %s236_s11 }
   0x7   :  { %v175_v5 = vmul.f32 -21.0, %v23_v0  ;;  %252 = vrcp.f32 %v24_v1  ;;  %v55_v7 = vand.u32 2147483647, %v24_v1  ;;  %v57_v8 = vand.u32 2147483648, %v24_v1 }
   0x8   :  { %v159_v9 = vmul.f32 %v151_v4, %v151_v4  ;;  %v152_v11 = vmul.f32 %v24_v1, %v24_v1  ;;  %v176_v12 = vmul.f32 -21.0, %v24_v1  ;;  %vm36_vm0 = vweird.f32 %v23_v0 }
   0x9   :  { %v183_v10 = vadd.f32 48.0, %v175_v5  ;;  %vm51_vm1 = vweird.f32 %v24_v1  ;;  %254 = vrcp.f32 %v333_v6  ;;  %vm336_vm2 = vcmp.eq.f32.partialorder %v40_v2, 8.507059e+37 }
   0xa   :  { %v43_v14 = vor.u32 1.1754944e-38, %v42_v3  ;;  %v160_v16 = vmul.f32 %v152_v11, %v152_v11  ;;  %v184_v17 = vadd.f32 48.0, %v176_v12  ;;  %vm340_vm3 = vcmp.eq.f32.partialorder %v55_v7, 8.507059e+37  ;;  %v398_v11 = vld [vmem:[#allocation2 + $0x28] sm:$0xff] }
   0xb   :  { %v191_v15 = vmul.f32 %v183_v10, %v23_v0  ;;  %v58_v20 = vor.u32 1.1754944e-38, %v57_v8  ;;  %v153_v21 = vmul.f32 %v333_v6, %v333_v6  ;;  %v177_v22 = vmul.f32 -21.0, %v333_v6 }
   0xc   :  { %v251_v18 = vpop.eup %250  ;;  %v167_v25 = vmul.f32 %v159_v9, %v23_v0  ;;  %vm66_vm4 = vweird.f32 %v333_v6  ;;  %v70_v26 = vand.u32 2147483647, %v333_v6  ;;  %v192_v30 = vmul.f32 %v184_v17, %v24_v1 }
   0xd   :  { %v253_v23 = vpop.eup %252  ;;  %v32_v24 = vmul.f32 %v251_v18, %v23_v0  ;;  %vm37_vm5 = vweird.f32 %v251_v18  ;;  %v199_v28 = vadd.f32 -28.0, %v191_v15  ;;  %v168_v32 = vmul.f32 %v160_v16, %v24_v1 }
   0xe   :  { %v47_v29 = vmul.f32 %v253_v23, %v24_v1  ;;  %vm52_vm6 = vweird.f32 %v253_v23  ;;  %v161_v33 = vmul.f32 %v153_v21, %v153_v21  ;;  %v200_v36 = vadd.f32 -28.0, %v192_v30  ;;  %vm360_vm8 = vmor %vm36_vm0, %vm37_vm5  ;;  %v388_v1 = vld [vmem:[#allocation2 + $0x20] sm:$0xff] }
   0xf   :  { %v33_v31 = vsub.f32 1.0, %v32_v24  ;;  %v255_v34 = vpop.eup %254  ;;  %v185_v37 = vadd.f32 48.0, %v177_v22  ;;  %256 = vrcp.f32 %v349_v27  ;;  %vm353_vm7 = vcmp.eq.f32.partialorder %v70_v26, 8.507059e+37  ;;  %vm368_vm9 = vmor %vm51_vm1, %vm52_vm6 }
  0x10   :  { %v48_v35 = vsub.f32 1.0, %v47_v29  ;;  %v62_v39 = vmul.f32 %v255_v34, %v333_v6  ;;  %v72_v41 = vand.u32 2147483648, %v333_v6  ;;  %v207_v43 = vmul.f32 %v199_v28, %v167_v25 }
  0x11   :  { %v34_v38 = vmul.f32 %v251_v18, %v33_v31  ;;  %v169_v45 = vmul.f32 %v161_v33, %v333_v6  ;;  %v193_v46 = vmul.f32 %v185_v37, %v333_v6  ;;  %v208_v49 = vmul.f32 %v200_v36, %v168_v32  ;;  %v423_v33 = vld [vmem:[#allocation2 + $0x30] sm:$0xff] }
  0x12   :  { %v49_v44 = vmul.f32 %v253_v23, %v48_v35  ;;  %v63_v50 = vsub.f32 1.0, %v62_v39  ;;  %vm67_vm10 = vweird.f32 %v255_v34  ;;  %v154_v53 = vmul.f32 %v349_v27, %v349_v27 }
  0x13   :  { %v35_v47 = vadd.f32 %v251_v18, %v34_v38  ;;  %v201_v52 = vadd.f32 -28.0, %v193_v46  ;;  %v178_v54 = vmul.f32 -21.0, %v349_v27  ;;  %v73_v57 = vor.u32 1.1754944e-38, %v72_v41  ;;  %vm384_vm11 = vmor %vm66_vm4, %vm67_vm10 }
  0x14   :  { %v50_v51 = vadd.f32 %v253_v23, %v49_v44  ;;  %v64_v56 = vmul.f32 %v255_v34, %v63_v50  ;;  %v87_v58 = vand.u32 2147483648, %v349_v27  ;;  %v162_v0 = vmul.f32 %v154_v53, %v154_v53 }
  0x15   :  { %v39_v55 = vsel %vm360_vm8, %v251_v18, %v35_v47  ;;  %v257_v59 = vpop.eup %256  ;;  %v209_v63 = vmul.f32 %v201_v52, %v169_v45  ;;  %vm81_vm12 = vweird.f32 %v349_v27  ;;  %v85_v6 = vand.u32 2147483647, %v349_v27  ;;  %v432_v45 = vld [vmem:[#allocation2 + $0x38] sm:$0xff] }
  0x16   :  { %v44_v60 = vsel %vm336_vm2, %v43_v14, %v39_v55  ;;  %v54_v61 = vsel %vm368_vm9, %v253_v23, %v50_v51  ;;  %v65_v4 = vadd.f32 %v255_v34, %v64_v56  ;;  %v77_v5 = vmul.f32 %v257_v59, %v349_v27 }
  0x17   :  { %v215_v2 = vadd.f32 %v207_v43, %v44_v60  ;;  %v59_v3 = vsel %vm340_vm3, %v58_v20, %v54_v61  ;;  %v186_v8 = vadd.f32 48.0, %v178_v54  ;;  %vm82_vm13 = vweird.f32 %v257_v59 }
  0x18   :  { %v216_v7 = vadd.f32 %v208_v49, %v59_v3  ;;  %v69_v9 = vsel %vm384_vm11, %v255_v34, %v65_v4  ;;  %v78_v10 = vsub.f32 1.0, %v77_v5  ;;  %258 = vrcp.f32 %v388_v1  ;;  %vm409_vm14 = vmor %vm81_vm12, %vm82_vm13 }
  0x19   :  { %223 = vst [vmem:[#allocation5] sm:$0xff] %v215_v2  ;;  %v74_v12 = vsel %vm353_vm7, %v73_v57, %v69_v9  ;;  %v88_v13 = vor.u32 1.1754944e-38, %v87_v58  ;;  %v170_v14 = vmul.f32 %v162_v0, %v349_v27  ;;  %v194_v15 = vmul.f32 %v186_v8, %v349_v27 }
  0x1a   :  { %224 = vst [vmem:[#allocation5 + $0x8] sm:$0xff] %v216_v7  ;;  %v217_v16 = vadd.f32 %v209_v63, %v74_v12  ;;  %v79_v17 = vmul.f32 %v257_v59, %v78_v10  ;;  %v155_v18 = vmul.f32 %v388_v1, %v388_v1  ;;  %v179_v19 = vmul.f32 -21.0, %v388_v1 }
  0x1b   :  { %v202_v21 = vadd.f32 -28.0, %v194_v15  ;;  %v100_v22 = vand.u32 2147483647, %v388_v1  ;;  %v102_v23 = vand.u32 2147483648, %v388_v1  ;;  %260 = vrcp.f32 %v398_v11 }
  0x1c   :  { %225 = vst [vmem:[#allocation5 + $0x10] sm:$0xff] %v217_v16  ;;  %v80_v24 = vadd.f32 %v257_v59, %v79_v17  ;;  %vm86_vm15 = vcmp.eq.f32.partialorder %v85_v6, 8.507059e+37  ;;  %v163_v25 = vmul.f32 %v155_v18, %v155_v18  ;;  %v187_v26 = vadd.f32 48.0, %v179_v19 }
  0x1d   :  { %v210_v28 = vmul.f32 %v202_v21, %v170_v14  ;;  %v156_v27 = vmul.f32 %v398_v11, %v398_v11  ;;  %vm96_vm0 = vweird.f32 %v388_v1  ;;  %v180_v32 = vmul.f32 -21.0, %v398_v11 }
  0x1e   :  { %v259_v29 = vpop.eup %258  ;;  %v84_v30 = vsel %vm409_vm14, %v257_v59, %v80_v24  ;;  %v195_v31 = vmul.f32 %v187_v26, %v388_v1  ;;  %vm426_vm1 = vcmp.eq.f32.partialorder %v100_v22, 8.507059e+37  ;;  %v103_v37 = vor.u32 1.1754944e-38, %v102_v23 }
  0x1f   :  { %v89_v34 = vsel %vm86_vm15, %v88_v13, %v84_v30  ;;  %v92_v35 = vmul.f32 %v259_v29, %v388_v1  ;;  %vm97_vm2 = vweird.f32 %v259_v29  ;;  %v171_v39 = vmul.f32 %v163_v25, %v388_v1 }
  0x20   :  { %v218_v38 = vadd.f32 %v210_v28, %v89_v34  ;;  %v164_v40 = vmul.f32 %v156_v27, %v156_v27  ;;  %v203_v43 = vadd.f32 -28.0, %v195_v31  ;;  %v188_v44 = vadd.f32 48.0, %v180_v32  ;;  %vm443_vm5 = vmor %vm96_vm0, %vm97_vm2 }
  0x21   :  { %v261_v41 = vpop.eup %260  ;;  %v93_v42 = vsub.f32 1.0, %v92_v35  ;;  %262 = vrcp.f32 %v423_v33  ;;  %vm111_vm3 = vweird.f32 %v398_v11  ;;  %v115_v47 = vand.u32 2147483647, %v398_v11 }
  0x22   :  { %226 = vst [vmem:[#allocation5 + $0x18] sm:$0xff] %v218_v38  ;;  %v107_v46 = vmul.f32 %v261_v41, %v398_v11  ;;  %v117_v48 = vand.u32 2147483648, %v398_v11  ;;  %vm112_vm4 = vweird.f32 %v261_v41  ;;  %v172_v50 = vmul.f32 %v164_v40, %v398_v11 }
  0x23   :  { %v94_v49 = vmul.f32 %v259_v29, %v93_v42  ;;  %v196_v51 = vmul.f32 %v188_v44, %v398_v11  ;;  %v157_v54 = vmul.f32 %v423_v33, %v423_v33  ;;  %v181_v55 = vmul.f32 -21.0, %v423_v33  ;;  %vm461_vm7 = vmor %vm111_vm3, %vm112_vm4 }
  0x24   :  { %v108_v53 = vsub.f32 1.0, %v107_v46  ;;  %264 = vrcp.f32 %v432_v45  ;;  %v211_v57 = vmul.f32 %v203_v43, %v171_v39  ;;  %v132_v59 = vand.u32 2147483648, %v423_v33 }
  0x25   :  { %v95_v56 = vadd.f32 %v259_v29, %v94_v49  ;;  %v204_v58 = vadd.f32 -28.0, %v196_v51  ;;  %vm452_vm6 = vcmp.eq.f32.partialorder %v115_v47, 8.507059e+37  ;;  %v165_v62 = vmul.f32 %v157_v54, %v157_v54 }
  0x26   :  { %v109_v60 = vmul.f32 %v261_v41, %v108_v53  ;;  %v189_v63 = vadd.f32 48.0, %v181_v55  ;;  %v118_v3 = vor.u32 1.1754944e-38, %v117_v48  ;;  %vm126_vm8 = vweird.f32 %v423_v33 }
  0x27   :  { %v263_v0 = vpop.eup %262  ;;  %v99_v1 = vsel %vm443_vm5, %v259_v29, %v95_v56  ;;  %v130_v4 = vand.u32 2147483647, %v423_v33  ;;  %v212_v6 = vmul.f32 %v204_v58, %v172_v50  ;;  %v133_v10 = vor.u32 1.1754944e-38, %v132_v59 }
  0x28   :  { %v104_v5 = vsel %vm426_vm1, %v103_v37, %v99_v1  ;;  %v110_v7 = vadd.f32 %v261_v41, %v109_v60  ;;  %v122_v8 = vmul.f32 %v263_v0, %v423_v33  ;;  %vm127_vm9 = vweird.f32 %v263_v0 }
  0x29   :  { %v219_v9 = vadd.f32 %v211_v57, %v104_v5  ;;  %v197_v11 = vmul.f32 %v189_v63, %v423_v33  ;;  %v173_v15 = vmul.f32 %v165_v62, %v423_v33  ;;  %v158_v16 = vmul.f32 %v432_v45, %v432_v45  ;;  %vm484_vm10 = vmor %vm126_vm8, %vm127_vm9 }
  0x2a   :  { %v265_v12 = vpop.eup %264  ;;  %v114_v13 = vsel %vm461_vm7, %v261_v41, %v110_v7  ;;  %v123_v14 = vsub.f32 1.0, %v122_v8  ;;  %v147_v20 = vand.u32 2147483648, %v432_v45  ;;  %v182_v24 = vmul.f32 -21.0, %v432_v45 }
  0x2b   :  { %227 = vst [vmem:[#allocation5 + $0x20] sm:$0xff] %v219_v9  ;;  %v119_v17 = vsel %vm452_vm6, %v118_v3, %v114_v13  ;;  %v205_v18 = vadd.f32 -28.0, %v197_v11  ;;  %v137_v19 = vmul.f32 %v265_v12, %v432_v45  ;;  %v166_v23 = vmul.f32 %v158_v16, %v158_v16 }
  0x2c   :  { %v220_v21 = vadd.f32 %v212_v6, %v119_v17  ;;  %v124_v22 = vmul.f32 %v263_v0, %v123_v14  ;;  %vm141_vm11 = vweird.f32 %v432_v45  ;;  %vm142_vm12 = vweird.f32 %v265_v12 }
  0x2d   :  { %v138_v26 = vsub.f32 1.0, %v137_v19  ;;  %v145_v28 = vand.u32 2147483647, %v432_v45  ;;  %vm131_vm13 = vcmp.eq.f32.partialorder %v130_v4, 8.507059e+37  ;;  %v213_v29 = vmul.f32 %v205_v18, %v173_v15  ;;  %vm143_vm14 = vmor %vm141_vm11, %vm142_vm12 }
  0x2e   :  { %228 = vst [vmem:[#allocation5 + $0x28] sm:$0xff] %v220_v21  ;;  %v125_v27 = vadd.f32 %v263_v0, %v124_v22  ;;  %v190_v30 = vadd.f32 48.0, %v182_v24  ;;  %v148_v33 = vor.u32 1.1754944e-38, %v147_v20  ;;  %v174_v34 = vmul.f32 %v166_v23, %v432_v45 }
  0x2f   :  { %v139_v31 = vmul.f32 %v265_v12, %v138_v26  ;;  %vm146_vm15 = vcmp.eq.f32.partialorder %v145_v28, 8.507059e+37 }
  0x30   :  { %v129_v32 = vsel %vm484_vm10, %v263_v0, %v125_v27  ;;  %v198_v35 = vmul.f32 %v190_v30, %v432_v45 }
  0x31   :  { %v134_v36 = vsel %vm131_vm13, %v133_v10, %v129_v32  ;;  %v140_v37 = vadd.f32 %v265_v12, %v139_v31 }
  0x32   :  { %v221_v38 = vadd.f32 %v213_v29, %v134_v36  ;;  %v206_v39 = vadd.f32 -28.0, %v198_v35 }
  0x33   :  { %v144_v40 = vsel %vm143_vm14, %v265_v12, %v140_v37 }
  0x34   :  { %229 = vst [vmem:[#allocation5 + $0x30] sm:$0xff] %v221_v38  ;;  %v149_v41 = vsel %vm146_vm15, %v148_v33, %v144_v40  ;;  %v214_v42 = vmul.f32 %v206_v39, %v174_v34 }
  0x36   :  { %v222_v43 = vadd.f32 %v214_v42, %v149_v41 }
  0x38   :  { %230 = vst [vmem:[#allocation5 + $0x38] sm:$0xff] %v222_v43 }
  0x39   :  { %241 = dma.vmem_to_hbm [thread:$0]  %s237_s11, 1024, %s239_s14, [#allocation4]  }
  0x3a   :  { %316 = dma.done.wait [#allocation4], 1024  }
  0x3b   :  { %317 = vsyncadd [#allocation4], 4294966272 }
  0x3c   :  { %246 = vsyncpa [#allocation3], 1 }
  0x3d   :  { %247 = vsyncpa [#allocation4], 1 }

</bundles_post_ra>
